<compile_context>
chip_gen: v6e
topology: v6e:2x2x1
jax: 0.10.0
libtpu: 0.0.40
codegen_flags: <defaults>
</compile_context>

<pallas_src>
import jax
import jax.numpy as jnp
from jax.experimental import pallas as pl
from jax.experimental.pallas import tpu as pltpu

BATCH = 2
L_IN = 8            # fc1 expects 16*2*1 features -> input length must be 8
MAX_STATE = 10

PACK_LANES = 128

# Bit-reversed length permutation: with rows ordered (LPERM[k], b), each of the
# two pooling stages is exactly max(first_half_rows, second_half_rows).
_LPERM = (0, 4, 2, 6, 1, 5, 3, 7)

# ---- packed-parameter layout (all segments 8-row aligned, lanes start at 0) ----
_SEG_SHAPES = {
    "w1":  (1, 6),        # conv1 weight  (cin=1, cout=6)
    "b1":  (1, 6),
    "w2":  (6, 16),       # conv2 weight  (cin=6, cout=16)
    "b2":  (1, 16),
    "wf1": (32, 120),     # fc1 weight, fused & permuted to [Q0 ch | Q1 ch] row order
    "bf1": (1, 120),
    "wf2": (120, 84),
    "bf2": (1, 84),
    "wf3": (84, MAX_STATE),
    "bf3": (1, MAX_STATE),
}
_SEG_ORDER = ["w1", "b1", "w2", "b2", "wf1", "bf1", "wf2", "bf2", "wf3", "bf3"]


def _round_up(n, m=8):
    return (n + m - 1) // m * m


_SEG_OFF = {}
_off = 0
for _name in _SEG_ORDER:
    _SEG_OFF[_name] = _off
    _off += _round_up(_SEG_SHAPES[_name][0])
PACK_ROWS = _off  # 296, multiple of 8


def prepare_params(params):
    """One-time parameter re-layout + packing (hoisted out of the per-call path)."""
    (conv1_w, conv1_b, conv2_w, conv2_b,
     fc1_w, fc1_b, fc2_w, fc2_b, fc3_w, fc3_b) = params

    # PyTorch flatten of pooled (16, 2) indexes features as c*2 + q. The kernel
    # presents features as [Q0 channels (16) | Q1 channels (16)], so interleave
    # the fc1 weight accordingly: fused row j<16 -> fc1_w[:, 2j]; j>=16 -> fc1_w[:, 2(j-16)+1].
    fc1_r = fc1_w.reshape(120, 16, 2)
    segs = {
        "w1":  conv1_w[:, :, 0].T,                                          # (1, 6)
        "b1":  conv1_b[None, :],                                            # (1, 6)
        "w2":  conv2_w[:, :, 0].T,                                          # (6, 16)
        "b2":  conv2_b[None, :],                                            # (1, 16)
        "wf1": jnp.concatenate([fc1_r[:, :, 0], fc1_r[:, :, 1]], axis=1).T, # (32, 120)
        "bf1": fc1_b[None, :],                                              # (1, 120)
        "wf2": fc2_w.T,                                                     # (120, 84)
        "bf2": fc2_b[None, :],                                              # (1, 84)
        "wf3": fc3_w.T,                                                     # (84, 10)
        "bf3": fc3_b[None, :],                                              # (1, 10)
    }
    buf = jnp.zeros((PACK_ROWS, PACK_LANES), jnp.float32)
    for name in _SEG_ORDER:
        seg = jnp.asarray(segs[name], jnp.float32)
        r0 = _SEG_OFF[name]
        nr, nc = _SEG_SHAPES[name]
        assert seg.shape == (nr, nc)
        buf = buf.at[r0:r0 + nr, 0:nc].set(seg)
    return buf


def net_kernel(x_ref, p_ref, o_ref):
    def seg(name):
        r0 = _SEG_OFF[name]
        nr, nc = _SEG_SHAPES[name]
        return p_ref[r0:r0 + nr, 0:nc]     # static, 8-aligned slice of packed params

    nb = x_ref.shape[0] // L_IN            # batch size (static)
    x = x_ref[...]                         # (nb*8, 1) rows ordered (bit-reversed l, b)

    # conv1 (k=1, cin=1): broadcast multiply over 6 output channels + ReLU.
    h = jnp.maximum(x * seg("w1") + seg("b1"), 0.0)                   # (nb*8, 6)
    # max_pool1d(2): bit-reversed row order -> pool = max of contiguous halves.
    h = jnp.maximum(h[:nb * 4, :], h[nb * 4:, :])                     # (nb*4, 6)
    # conv2 (k=1): pointwise channel mix as one batched matmul + ReLU.
    h = jnp.maximum(
        jnp.dot(h, seg("w2"), preferred_element_type=jnp.float32) + seg("b2"),
        0.0)                                                          # (nb*4, 16)
    h = jnp.maximum(h[:nb * 2, :], h[nb * 2:, :])                     # (nb*2, 16): [Q0 rows | Q1 rows]

    # flatten (PyTorch c*2+q order, via the pre-permuted weight) + fc1 as ONE matmul.
    hcat = jnp.concatenate([h[:nb, :], h[nb:, :]], axis=1)            # (nb, 32)
    z = jnp.maximum(
        jnp.dot(hcat, seg("wf1"), preferred_element_type=jnp.float32) + seg("bf1"),
        0.0)                                                          # (nb, 120)
    z = jnp.maximum(
        jnp.dot(z, seg("wf2"), preferred_element_type=jnp.float32) + seg("bf2"),
        0.0)                                                          # (nb, 84)
    logits = (jnp.dot(z, seg("wf3"), preferred_element_type=jnp.float32)
              + seg("bf3"))                                           # (nb, MAX_STATE)

    # softmax over classes (F.softmax default dim=1 for 2D input).
    m = jnp.max(logits, axis=-1, keepdims=True)
    e = jnp.exp(logits - m)
    inv = pl.reciprocal(jnp.sum(e, axis=-1, keepdims=True))  # exact; keeps 1e-5 parity with ref
    o_ref[...] = (e * inv).astype(o_ref.dtype)                # single full-tile store


@jax.jit
def net_forward(x_ncl, packed_params):
    """x_ncl: (B, 1, L) float32 (same layout as the PyTorch module); packed_params from prepare_params."""
    B = x_ncl.shape[0]
    xt = x_ncl[:, 0, :]                                   # (B, 8)
    xp = jnp.take(xt, jnp.array(_LPERM, jnp.int32), axis=1)  # bit-reversed length order
    x_rows = xp.T.reshape(B * L_IN, 1)                    # (B*8, 1): row r -> (l=LPERM[r//B], b=r%B)

    return pl.pallas_call(
        net_kernel,
        out_shape=jax.ShapeDtypeStruct((B, MAX_STATE), jnp.float32),
        in_specs=[pl.BlockSpec(memory_space=pltpu.MemorySpace.VMEM),
                  pl.BlockSpec(memory_space=pltpu.MemorySpace.VMEM)],
        out_specs=pl.BlockSpec(memory_space=pltpu.MemorySpace.VMEM),
    )(x_rows, packed_params)


def net_reference(x_ncl, params):
    """Pure-JAX reproduction of the PyTorch forward (NCL layout) for validation."""
    (conv1_w, conv1_b, conv2_w, conv2_b,
     fc1_w, fc1_b, fc2_w, fc2_b, fc3_w, fc3_b) = params
    B = x_ncl.shape[0]
    y = jnp.einsum('oi,bil->bol', conv1_w[:, :, 0], x_ncl) + conv1_b[None, :, None]
    y = jnp.maximum(y, 0.0)
    y = jnp.max(y.reshape(B, 6, y.shape[-1] // 2, 2), axis=-1)
    y = jnp.einsum('oi,bil->bol', conv2_w[:, :, 0], y) + conv2_b[None, :, None]
    y = jnp.maximum(y, 0.0)
    y = jnp.max(y.reshape(B, 16, y.shape[-1] // 2, 2), axis=-1)
    f = y.reshape(B, 16 * 2)                              # PyTorch flatten order (C-major)
    f = jnp.maximum(f @ fc1_w.T + fc1_b, 0.0)
    f = jnp.maximum(f @ fc2_w.T + fc2_b, 0.0)
    logits = f @ fc3_w.T + fc3_b
    return jax.nn.softmax(logits, axis=1)


if __name__ == "__main__":
    key = jax.random.PRNGKey(0)
    ks = jax.random.split(key, 11)

    def uinit(k, shape, fan_in):
        bound = 1.0 / (fan_in ** 0.5)
        return jax.random.uniform(k, shape, jnp.float32, -bound, bound)

    # Deterministic parameters in PyTorch shape conventions.
    params = (
        uinit(ks[0], (6, 1, 1), 1),          # conv1.weight
        uinit(ks[1], (6,), 1),               # conv1.bias
        uinit(ks[2], (16, 6, 1), 6),         # conv2.weight
        uinit(ks[3], (16,), 6),              # conv2.bias
        uinit(ks[4], (120, 32), 32),         # fc1.weight
        uinit(ks[5], (120,), 32),            # fc1.bias
        uinit(ks[6], (84, 120), 120),        # fc2.weight
        uinit(ks[7], (84,), 120),            # fc2.bias
        uinit(ks[8], (MAX_STATE, 84), 84),   # fc3.weight
        uinit(ks[9], (MAX_STATE,), 84),      # fc3.bias
    )
    x = jax.random.normal(ks[10], (BATCH, 1, L_IN), jnp.float32)   # NCL, like PyTorch

    packed = jax.block_until_ready(prepare_params(params))   # one-time re-layout (hot path excluded)
    out = jax.block_until_ready(net_forward(x, packed))
    ref = jax.block_until_ready(net_reference(x, params))

    assert out.shape == (BATCH, MAX_STATE)
    assert jnp.allclose(out, ref, atol=1e-5, rtol=1e-5), (out, ref)
    # TODO(synk): the PyTorch forward's `print(x.shape)` debug statement is intentionally omitted.
    print("KERNEL_OK")
</pallas_src>

<mosaic_0001>
module attributes {stable_mosaic.version = 11 : i64} {
  func.func @net_kernel(%arg0: memref<16x1xf32, #tpu.memory_space<vmem>>, %arg1: memref<296x128xf32, #tpu.memory_space<vmem>>, %arg2: memref<2x10xf32, #tpu.memory_space<vmem>>) attributes {dimension_semantics = [], scalar_prefetch = 0 : i64, scratch_operands = 0 : i64, tpu.core_type = #tpu.core_type<tc>} {
    %c0 = arith.constant 0 : index
    %c0_0 = arith.constant 0 : index
    %0 = vector.load %arg0[%c0, %c0_0] : memref<16x1xf32, #tpu.memory_space<vmem>>, vector<16x1xf32>
    %c0_1 = arith.constant 0 : index
    %c0_2 = arith.constant 0 : index
    %1 = vector.load %arg1[%c0_1, %c0_2] : memref<296x128xf32, #tpu.memory_space<vmem>>, vector<1x6xf32>
    %2 = vector.broadcast %0 : vector<16x1xf32> to vector<16x6xf32>
    %3 = vector.broadcast %1 : vector<1x6xf32> to vector<16x6xf32>
    %4 = arith.mulf %2, %3 : vector<16x6xf32>
    %c8 = arith.constant 8 : index
    %c0_3 = arith.constant 0 : index
    %5 = vector.load %arg1[%c8, %c0_3] : memref<296x128xf32, #tpu.memory_space<vmem>>, vector<1x6xf32>
    %6 = vector.broadcast %5 : vector<1x6xf32> to vector<16x6xf32>
    %7 = arith.addf %4, %6 : vector<16x6xf32>
    %cst = arith.constant 0.000000e+00 : f32
    %8 = vector.broadcast %cst : f32 to vector<16x6xf32>
    %9 = arith.maximumf %7, %8 : vector<16x6xf32>
    %10 = vector.extract_strided_slice %9 {offsets = [0, 0], sizes = [8, 6], strides = [1, 1]} : vector<16x6xf32> to vector<8x6xf32>
    %11 = vector.extract_strided_slice %9 {offsets = [8, 0], sizes = [8, 6], strides = [1, 1]} : vector<16x6xf32> to vector<8x6xf32>
    %12 = arith.maximumf %10, %11 : vector<8x6xf32>
    %c16 = arith.constant 16 : index
    %c0_4 = arith.constant 0 : index
    %13 = vector.load %arg1[%c16, %c0_4] : memref<296x128xf32, #tpu.memory_space<vmem>>, vector<6x16xf32>
    %cst_5 = arith.constant dense<0.000000e+00> : vector<8x16xf32>
    %14 = tpu.matmul %12, %13, %cst_5 {dimension_numbers = #tpu.dot_dimension_numbers<[1], [0], [0], [1], [0, 0, 1, 1], [], []>} : vector<8x6xf32>, vector<6x16xf32>, vector<8x16xf32> -> vector<8x16xf32>
    %c24 = arith.constant 24 : index
    %c0_6 = arith.constant 0 : index
    %15 = vector.load %arg1[%c24, %c0_6] : memref<296x128xf32, #tpu.memory_space<vmem>>, vector<1x16xf32>
    %16 = vector.broadcast %15 : vector<1x16xf32> to vector<8x16xf32>
    %17 = arith.addf %14, %16 : vector<8x16xf32>
    %cst_7 = arith.constant 0.000000e+00 : f32
    %18 = vector.broadcast %cst_7 : f32 to vector<8x16xf32>
    %19 = arith.maximumf %17, %18 : vector<8x16xf32>
    %20 = vector.extract_strided_slice %19 {offsets = [0, 0], sizes = [4, 16], strides = [1, 1]} : vector<8x16xf32> to vector<4x16xf32>
    %21 = vector.extract_strided_slice %19 {offsets = [4, 0], sizes = [4, 16], strides = [1, 1]} : vector<8x16xf32> to vector<4x16xf32>
    %22 = arith.maximumf %20, %21 : vector<4x16xf32>
    %23 = vector.extract_strided_slice %22 {offsets = [0, 0], sizes = [2, 16], strides = [1, 1]} : vector<4x16xf32> to vector<2x16xf32>
    %24 = vector.extract_strided_slice %22 {offsets = [2, 0], sizes = [2, 16], strides = [1, 1]} : vector<4x16xf32> to vector<2x16xf32>
    %25 = tpu.concatenate %23, %24 in 1 : vector<2x16xf32>, vector<2x16xf32> -> vector<2x32xf32>
    %c32 = arith.constant 32 : index
    %c0_8 = arith.constant 0 : index
    %26 = vector.load %arg1[%c32, %c0_8] : memref<296x128xf32, #tpu.memory_space<vmem>>, vector<32x120xf32>
    %cst_9 = arith.constant dense<0.000000e+00> : vector<2x120xf32>
    %27 = tpu.matmul %25, %26, %cst_9 {dimension_numbers = #tpu.dot_dimension_numbers<[1], [0], [0], [1], [0, 0, 1, 1], [], []>} : vector<2x32xf32>, vector<32x120xf32>, vector<2x120xf32> -> vector<2x120xf32>
    %c64 = arith.constant 64 : index
    %c0_10 = arith.constant 0 : index
    %28 = vector.load %arg1[%c64, %c0_10] : memref<296x128xf32, #tpu.memory_space<vmem>>, vector<1x120xf32>
    %29 = vector.broadcast %28 : vector<1x120xf32> to vector<2x120xf32>
    %30 = arith.addf %27, %29 : vector<2x120xf32>
    %cst_11 = arith.constant 0.000000e+00 : f32
    %31 = vector.broadcast %cst_11 : f32 to vector<2x120xf32>
    %32 = arith.maximumf %30, %31 : vector<2x120xf32>
    %c72 = arith.constant 72 : index
    %c0_12 = arith.constant 0 : index
    %33 = vector.load %arg1[%c72, %c0_12] : memref<296x128xf32, #tpu.memory_space<vmem>>, vector<120x84xf32>
    %cst_13 = arith.constant dense<0.000000e+00> : vector<2x84xf32>
    %34 = tpu.matmul %32, %33, %cst_13 {dimension_numbers = #tpu.dot_dimension_numbers<[1], [0], [0], [1], [0, 0, 1, 1], [], []>} : vector<2x120xf32>, vector<120x84xf32>, vector<2x84xf32> -> vector<2x84xf32>
    %c192 = arith.constant 192 : index
    %c0_14 = arith.constant 0 : index
    %35 = vector.load %arg1[%c192, %c0_14] : memref<296x128xf32, #tpu.memory_space<vmem>>, vector<1x84xf32>
    %36 = vector.broadcast %35 : vector<1x84xf32> to vector<2x84xf32>
    %37 = arith.addf %34, %36 : vector<2x84xf32>
    %cst_15 = arith.constant 0.000000e+00 : f32
    %38 = vector.broadcast %cst_15 : f32 to vector<2x84xf32>
    %39 = arith.maximumf %37, %38 : vector<2x84xf32>
    %c200 = arith.constant 200 : index
    %c0_16 = arith.constant 0 : index
    %40 = vector.load %arg1[%c200, %c0_16] : memref<296x128xf32, #tpu.memory_space<vmem>>, vector<84x10xf32>
    %cst_17 = arith.constant dense<0.000000e+00> : vector<2x10xf32>
    %41 = tpu.matmul %39, %40, %cst_17 {dimension_numbers = #tpu.dot_dimension_numbers<[1], [0], [0], [1], [0, 0, 1, 1], [], []>} : vector<2x84xf32>, vector<84x10xf32>, vector<2x10xf32> -> vector<2x10xf32>
    %c288 = arith.constant 288 : index
    %c0_18 = arith.constant 0 : index
    %42 = vector.load %arg1[%c288, %c0_18] : memref<296x128xf32, #tpu.memory_space<vmem>>, vector<1x10xf32>
    %43 = vector.broadcast %42 : vector<1x10xf32> to vector<2x10xf32>
    %44 = arith.addf %41, %43 : vector<2x10xf32>
    %cst_19 = arith.constant dense<0xFF800000> : vector<2xf32>
    %45 = vector.multi_reduction <maximumf>, %44, %cst_19 [1] : vector<2x10xf32> to vector<2xf32>
    %46 = vector.shape_cast %45 : vector<2xf32> to vector<2x1xf32>
    %47 = vector.broadcast %46 : vector<2x1xf32> to vector<2x10xf32>
    %48 = arith.subf %44, %47 : vector<2x10xf32>
    %49 = math.exp %48 : vector<2x10xf32>
    %cst_20 = arith.constant dense<0.000000e+00> : vector<2xf32>
    %50 = vector.multi_reduction <add>, %49, %cst_20 [1] : vector<2x10xf32> to vector<2xf32>
    %51 = vector.shape_cast %50 : vector<2xf32> to vector<2x1xf32>
    %52 = tpu.reciprocal %51 : vector<2x1xf32> -> vector<2x1xf32>
    %53 = vector.broadcast %52 : vector<2x1xf32> to vector<2x10xf32>
    %54 = arith.mulf %49, %53 : vector<2x10xf32>
    %c0_21 = arith.constant 0 : index
    %c0_22 = arith.constant 0 : index
    %55 = vector.load %arg2[%c0_21, %c0_22] : memref<2x10xf32, #tpu.memory_space<vmem>>, vector<2x10xf32>
    tpu.vector_store %arg2[%c0_21, %c0_22], %54 {strides = array<i32>} : memref<2x10xf32, #tpu.memory_space<vmem>>, vector<2x10xf32>,
    return
  }
}

</mosaic_0001>

<bundles_post_ra>
// kernel: net_forward.1
= control target key start
LH: loop header
LB: loop body
LE: loop exit
PB: predicated region body
PF: predicated region fallthrough
CT: control target
= control target key end

     0   :  { %7 = vsyncpa [#allocation3], 0  ;;  %s707_s0 = inlined_call_operand.vmem [shape: f32[16,1], index: 0, kind: input, shape index: {}]   ;;  %s708_s1 = inlined_call_operand.hbm [shape: f32[296,128], index: 1, kind: input, shape index: {}]   ;;  %s709_s2 = inlined_call_operand.hbm [shape: f32[2,10], index: 2, kind: output, shape index: {}]  }
   0x1   :  { %8 = vsyncpa [#allocation4], 0  ;;  %s630_s9 = smov [#allocation2]  }
   0x2   :  { %s16_s10 = sshll.u32 %s630_s9, 4  ;;  %s17_s10 = int_to_ptr.vmem [resolvable:$true] %s16_s10 }
   0x3   :  { %s594_s11 = scalar_lea.vmem %s17_s10, 4736  ;;  %p599_p1 = scmp.lt.s32.totalorder %s17_s10, %s17_s10 }
   0x4   :  { %p595_p0 = scmp.ne.s32.totalorder %s17_s10, %s594_s11  ;;  %p600_p2 = scmp.lt.s32.totalorder %s594_s11, %s594_s11 }
   0x6   :  { %p601_p3 = por %p600_p2, %p599_p1 }
   0x8   :  { %p602_p4 = pnand %p601_p3, %p595_p0 }
   0xa   :  { %605 = shalt.err (!%p602_p4)
}
   0xb   :  { %s631_s12 = smov 128   ;;  %s632_s13 = smov 8  }
   0xc   :  { %22 = dma.hbm_to_vmem [thread:$0]  %s708_s1, 4736, %s17_s10, [#allocation3], %s631_s12, %s631_s12, %s632_s13  }
   0xd   :  { %626 = dma.done.wait [#allocation3], 4736  }
   0xe   :  { %627 = vsyncadd [#allocation3], 4294962560  ;;  %v633_v0 = vmov 0   ;;  %v26_v1 = vld [vmem:[%s707_s0] sm:$0xff]  ;;  %v27_v2 = vld [vmem:[%s707_s0 + $0x8] sm:$0xff]  ;;  %v634_v3 = vmov 0.0  }
   0xf   :  { %581 = vset.pattern.permute.xlu0 %v633_v0  ;;  %499 = vmatprep.subr.mxu0 %v634_v3  ;;  %v55_v4 = vld [vmem:[#allocation2 + $0x10] sm:$0x3f]  ;;  %vm65_vm0 = vcmask 1045504   ;;  %vm635_vm1 = vmmov 0   ;;  %v452_v5 = vld [vmem:[#allocation2] ss:$0 sm:$0xff] }
  0x10   :  { %31 = vperm.xlu0 %581, %v26_v1   ;;  %504 = vmatprep.subr.mxu1 %v634_v3  ;;  %v453_v8 = vld [vmem:[#allocation2 + $0x8] ss:$0 sm:$0xff]  ;;  %vm61_vm2 = vcmask 48128   ;;  %v154_v16 = vld [vmem:[#allocation2 + $0x38] sm:$0xff]  ;;  %v153_v17 = vld [vmem:[#allocation2 + $0x30] sm:$0xff]  ;;  %s636_s0 = smov 16  }
  0x11   :  { %500 = vmatpush3.msk.msra.mxu0 %vm65_vm0, %v55_v4  ;;  %501 = vmatprep.mubr.msk.f32.mxu0 %vm635_vm1, %v634_v3  ;;  %v152_v18 = vld [vmem:[#allocation2 + $0x28] sm:$0xff]  ;;  %v151_v19 = vld [vmem:[#allocation2 + $0x20] sm:$0xff]  ;;  %v454_v20 = vld [vmem:[#allocation2 + $0x18] ss:$0 sm:$0xff]  ;;  %vm149_vm3 = vcmask 130048   ;;  %vm160_vm4 = vcmask 261120  }
  0x12   :  { %512 = vmatprep.mubr.msk.f32.mxu1 %vm635_vm1, %v634_v3  ;;  %515 = vmatprep.subr.mxu0 %v634_v3  ;;  %v249_v21 = vld [vmem:[#allocation2 + $0xb8] sm:$0xff]  ;;  %v248_v22 = vld [vmem:[#allocation2 + $0xb0] sm:$0xff]  ;;  %v247_v25 = vld [vmem:[#allocation2 + $0xa8] sm:$0xff]  ;;  %vm350_vm5 = vcmask 1043456   ;;  %vm255_vm6 = vcmask 982016   ;;  %vm346_vm7 = vcmask 687104  }
  0x13   :  { %505 = vmatpush3.msra.mxu1 %v154_v16  ;;  %v246_v28 = vld [vmem:[#allocation2 + $0xa0] sm:$0xff]  ;;  %v245_v30 = vld [vmem:[#allocation2 + $0x98] sm:$0xff]  ;;  %v244_v32 = vld [vmem:[#allocation2 + $0x90] sm:$0xff]  ;;  %vm424_vm8 = vcmask 74752   ;;  %s637_s1 = smov [#allocation5]  }
  0x14   :  { %36 = vperm.xlu0 %581, %v27_v2   ;;  %506 = vmatprep.subr.mxu1 %v634_v3  ;;  %v243_v34 = vld [vmem:[#allocation2 + $0x88] sm:$0xff]  ;;  %v242_v35 = vld [vmem:[#allocation2 + $0x80] sm:$0xff]  ;;  %v241_v36 = vld [vmem:[#allocation2 + $0x78] sm:$0xff]  ;;  %s443_s20 = sshll.u32 %s637_s1, 4  ;;  %s444_s20 = int_to_ptr.vmem [resolvable:$true] %s443_s20 }
  0x15   :  { %507 = vmatpush3.msra.mxu1 %v153_v17  ;;  %v240_v37 = vld [vmem:[#allocation2 + $0x70] sm:$0xff]  ;;  %v239_v38 = vld [vmem:[#allocation2 + $0x68] sm:$0xff]  ;;  %v238_v39 = vld [vmem:[#allocation2 + $0x60] sm:$0xff]  ;;  %s606_s21 = scalar_lea.vmem %s444_s20, 32  ;;  %p611_p6 = scmp.lt.s32.totalorder %s444_s20, %s444_s20 }
  0x16   :  { %508 = vmatprep.subr.mxu1 %v634_v3  ;;  %v237_v42 = vld [vmem:[#allocation2 + $0x58] sm:$0xff]  ;;  %v236_v43 = vld [vmem:[#allocation2 + $0x50] sm:$0xff]  ;;  %v235_v44 = vld [vmem:[#allocation2 + $0x48] sm:$0xff]  ;;  %p607_p5 = scmp.ne.s32.totalorder %s444_s20, %s606_s21  ;;  %p612_p7 = scmp.lt.s32.totalorder %s606_s21, %s606_s21 }
  0x17   :  { %509 = vmatpush3.msra.mxu1 %v152_v18  ;;  %v340_v45 = vld [vmem:[#allocation2 + $0x118] sm:$0xf]  ;;  %v339_v46 = vld [vmem:[#allocation2 + $0x110] sm:$0xff]  ;;  %v338_v47 = vld [vmem:[#allocation2 + $0x108] sm:$0xff] }
  0x18   :  { %510 = vmatprep.subr.mxu1 %v634_v3  ;;  %v337_v48 = vld [vmem:[#allocation2 + $0x100] sm:$0xff]  ;;  %v336_v49 = vld [vmem:[#allocation2 + $0xf8] sm:$0xff]  ;;  %v335_v50 = vld [vmem:[#allocation2 + $0xf0] sm:$0xff]  ;;  %p613_p8 = por %p612_p7, %p611_p6 }
  0x19   :  { %511 = vmatpush3.msra.mxu1 %v151_v19  ;;  %v334_v51 = vld [vmem:[#allocation2 + $0xe8] sm:$0xff]  ;;  %v333_v52 = vld [vmem:[#allocation2 + $0xe0] sm:$0xff]  ;;  %v332_v58 = vld [vmem:[#allocation2 + $0xd8] sm:$0xff] }
  0x1a   :  { %548 = vmatprep.subr.mxu1 %v634_v3  ;;  %v457_v53 = vld [vmem:[#allocation2 + $0x40] ss:$0 sm:$0xff]  ;;  %v331_v59 = vld [vmem:[#allocation2 + $0xd0] sm:$0xff]  ;;  %v330_v60 = vld [vmem:[#allocation2 + $0xc8] sm:$0xff]  ;;  %p614_p9 = pnand %p613_p8, %p607_p5 }
  0x1b   :  { %v459_v61 = vld [vmem:[#allocation2 + $0xc0] ss:$0 sm:$0xff] }
  0x1c   :  { %v461_v2 = vld [vmem:[#allocation2 + $0x120] ss:$0 sm:$0xff] }
  0x8b   :  { %v32_v6 = vpop.permute.xlu0 %31 }
  0x8c   :  { %v43_v7 = vmul.f32 %v452_v5, %v32_v6 }
  0x8e   :  { %v50_v10 = vadd.f32 %v453_v8, %v43_v7 }
  0x8f   :  { %v37_v9 = vpop.permute.xlu0 %36 }
  0x90   :  { %v44_v11 = vmul.f32 %v452_v5, %v37_v9  ;;  %v52_v13 = vmax.f32 %v50_v10, 0.0 }
  0x92   :  { %v51_v12 = vadd.f32 %v453_v8, %v44_v11 }
  0x94   :  { %v53_v14 = vmax.f32 %v51_v12, 0.0 }
  0x96   :  { %v54_v15 = vmax.f32 %v52_v13, %v53_v14 }
  0x98   :  { %502 = vmatmul.mubr.msk.f32.vlgmr.msra.gmra.mxu0 %vm61_vm2, %v54_v15 }
  0x99   :  { %545 = vmatprep.mubr.msk.f32.mxu0 %vm635_vm1, %v634_v3  ;;  %516 = vmatpush3.msra.mxu0 %v249_v21 }
  0x9a   :  { %517 = vmatprep.subr.mxu0 %v634_v3 }
  0x9b   :  { %518 = vmatpush3.msra.mxu0 %v248_v22 }
  0x9c   :  { %519 = vmatprep.subr.mxu0 %v634_v3 }
  0x9d   :  { %520 = vmatpush3.msra.mxu0 %v247_v25 }
  0x9e   :  { %521 = vmatprep.subr.mxu0 %v634_v3 }
  0x9f   :  { %522 = vmatpush3.msra.mxu0 %v246_v28 }
  0xa0   :  { %523 = vmatprep.subr.mxu0 %v634_v3 }
  0xa1   :  { %524 = vmatpush3.msra.mxu0 %v245_v30 }
  0xa2   :  { %525 = vmatprep.subr.mxu0 %v634_v3 }
  0xa3   :  { %526 = vmatpush3.msra.mxu0 %v244_v32 }
  0xa4   :  { %527 = vmatprep.subr.mxu0 %v634_v3 }
  0xa5   :  { %528 = vmatpush3.msra.mxu0 %v243_v34 }
  0xa6   :  { %529 = vmatprep.subr.mxu0 %v634_v3 }
  0xa7   :  { %530 = vmatpush3.msra.mxu0 %v242_v35 }
  0xa8   :  { %531 = vmatprep.subr.mxu0 %v634_v3 }
  0xa9   :  { %532 = vmatpush3.msra.mxu0 %v241_v36 }
  0xaa   :  { %533 = vmatprep.subr.mxu0 %v634_v3 }
  0xab   :  { %534 = vmatpush3.msra.mxu0 %v240_v37 }
  0xac   :  { %535 = vmatprep.subr.mxu0 %v634_v3 }
  0xad   :  { %536 = vmatpush3.msra.mxu0 %v239_v38 }
  0xae   :  { %537 = vmatprep.subr.mxu0 %v634_v3 }
  0xaf   :  { %538 = vmatpush3.msra.mxu0 %v238_v39 }
  0xb0   :  { %539 = vmatprep.subr.mxu0 %v634_v3 }
  0xb1   :  { %540 = vmatpush3.msra.mxu0 %v237_v42 }
  0xb2   :  { %541 = vmatprep.subr.mxu0 %v634_v3 }
  0xb3   :  { %542 = vmatpush3.msra.mxu0 %v236_v43 }
  0xb4   :  { %543 = vmatprep.subr.mxu0 %v634_v3 }
  0xb5   :  { %544 = vmatpush3.msra.mxu0 %v235_v44 }
 0x158   :  { %v135_v23 = vpop.f32.mrf.mxu0 }
 0x159   :  { %v136_v24 = vadd.f32 %v454_v20, %v135_v23 }
 0x15a   :  { %v503_v26 = vpop.f32.mrf.mxu0 }
 0x15b   :  { %v139_v27 = vmax.f32 %v136_v24, 0.0 }
 0x15d   :  { %v141_v29 = vrot.slane %v139_v27, 4 }
 0x15f   :  { %v143_v31 = vmax.f32 %v139_v27, %v141_v29 }
 0x161   :  { %v145_v33 = vrot.slane %v143_v31, 2 }
 0x163   :  { %146 = vrot.lane.b32.xlu1 %v145_v33, %s636_s0 }
 0x1d5   :  { %v147_v40 = vpop.permute.xlu1 %146 }
 0x1d6   :  { %v150_v41 = vsel %vm149_vm3, %v143_v31, %v147_v40 }
 0x1d7   :  { %513 = vmatmul.mubr.msk.f32.vlgmr.msra.gmra.mxu1 %vm160_vm4, %v150_v41 }
 0x1d8   :  { %570 = vmatprep.mubr.msk.f32.mxu1 %vm635_vm1, %v634_v3  ;;  %549 = vmatpush3.msk.msra.mxu1 %vm350_vm5, %v340_v45 }
 0x1d9   :  { %550 = vmatprep.subr.mxu1 %v634_v3 }
 0x1da   :  { %551 = vmatpush3.msra.mxu1 %v339_v46 }
 0x1db   :  { %552 = vmatprep.subr.mxu1 %v634_v3 }
 0x1dc   :  { %553 = vmatpush3.msra.mxu1 %v338_v47 }
 0x1dd   :  { %554 = vmatprep.subr.mxu1 %v634_v3 }
 0x1de   :  { %555 = vmatpush3.msra.mxu1 %v337_v48 }
 0x1df   :  { %556 = vmatprep.subr.mxu1 %v634_v3 }
 0x1e0   :  { %557 = vmatpush3.msra.mxu1 %v336_v49 }
 0x1e1   :  { %558 = vmatprep.subr.mxu1 %v634_v3 }
 0x1e2   :  { %559 = vmatpush3.msra.mxu1 %v335_v50 }
 0x1e3   :  { %560 = vmatprep.subr.mxu1 %v634_v3 }
 0x1e4   :  { %561 = vmatpush3.msra.mxu1 %v334_v51 }
 0x1e5   :  { %562 = vmatprep.subr.mxu1 %v634_v3 }
 0x1e6   :  { %563 = vmatpush3.msra.mxu1 %v333_v52 }
 0x1e7   :  { %564 = vmatprep.subr.mxu1 %v634_v3 }
 0x1e8   :  { %565 = vmatpush3.msra.mxu1 %v332_v58 }
 0x1e9   :  { %566 = vmatprep.subr.mxu1 %v634_v3 }
 0x1ea   :  { %567 = vmatpush3.msra.mxu1 %v331_v59 }
 0x1eb   :  { %568 = vmatprep.subr.mxu1 %v634_v3 }
 0x1ec   :  { %569 = vmatpush3.msra.mxu1 %v330_v60 }
 0x297   :  { %v230_v54 = vpop.f32.mrf.mxu1 }
 0x298   :  { %v231_v55 = vadd.f32 %v457_v53, %v230_v54 }
 0x299   :  { %v514_v56 = vpop.f32.mrf.mxu1 }
 0x29a   :  { %v234_v57 = vmax.f32 %v231_v55, 0.0 }
 0x29c   :  { %546 = vmatmul.mubr.msk.f32.vlgmr.msra.gmra.mxu0 %vm255_vm6, %v234_v57 }
 0x35c   :  { %v325_v62 = vpop.f32.mrf.mxu0 }
 0x35d   :  { %v326_v63 = vadd.f32 %v459_v61, %v325_v62 }
 0x35e   :  { %v547_v0 = vpop.f32.mrf.mxu0 }
 0x35f   :  { %v329_v1 = vmax.f32 %v326_v63, 0.0 }
 0x361   :  { %571 = vmatmul.mubr.msk.f32.vlgmr.msra.gmra.mxu1 %vm346_vm7, %v329_v1 }
 0x421   :  { %v420_v4 = vpop.f32.mrf.mxu1 }
 0x422   :  { %v421_v5 = vadd.f32 %v461_v2, %v420_v4 }
 0x423   :  { %v572_v6 = vpop.f32.mrf.mxu1 }
 0x424   :  { %v425_v7 = vsel %vm424_vm8, %v421_v5, -inf }
 0x425   :  { %426 = vmax.xlane.f32.xlu1 %v425_v7 }
 0x4ae   :  { %v427_v8 = vpop.xlane.xlu1 %426 }
 0x4af   :  { %v428_v9 = vsub.f32 %v421_v5, %v427_v8 }
 0x4b1   :  { %v429_v3 = vmul.f32 1.442695, %v428_v9 }
 0x4b3   :  { %582 = vpow2.f32 %v429_v3 }
 0x4c0   :  { %v583_v10 = vpop.eup %582 }
 0x4c1   :  { %v431_v11 = vsel %vm424_vm8, %v583_v10, 0.0 }
 0x4c2   :  { %432 = vadd.xlane.f32.xlu0 %v431_v11 }
 0x54b   :  { %v433_v12 = vpop.xlane.xlu0 %432 }
 0x54c   :  { %584 = vrcp.f32 %v433_v12 }
 0x559   :  { %v585_v13 = vpop.eup %584 }
 0x55a   :  { %v435_v14 = vmul.f32 %v585_v13, %v583_v10 }
 0x55c   :  { %436 = vst.msk [vmem:[#allocation5] sm:$0x3] %vm424_vm8, %v435_v14 }
 0x55d   :  { %617 = shalt.err (!%p614_p9)
}
 0x55e   :  { %446 = dma.vmem_to_hbm [thread:$0]  %s444_s20, 32, %s709_s2, [#allocation4]  }
 0x55f   :  { %628 = dma.done.wait [#allocation4], 32  }
 0x560   :  { %629 = vsyncadd [#allocation4], 4294967264 }
 0x561   :  { %450 = vsyncpa [#allocation3], 1 }
 0x562   :  { %451 = vsyncpa [#allocation4], 1 }

</bundles_post_ra>
